<compile_context>
chip_gen: v7x
topology: tpu7x:2x2x1
jax: 0.10.0
libtpu: 0.0.40
codegen_flags: <defaults>
</compile_context>

<pallas_src>
import functools

import jax
import jax.numpy as jnp
from jax.experimental import pallas as pl
from jax.experimental.pallas import tpu as pltpu


# ----------------------------------------------------------------------------
# Kernel: fused num_layers-deep MLP on one row tile.
# refs = (x_ref, w1, b1, w2, b2, ..., wL, bL, out_ref)
# ----------------------------------------------------------------------------
def _make_mlp_kernel(num_layers: int, mxu_dtype):
    def kernel(*refs):
        x_ref = refs[0]
        out_ref = refs[-1]

        h = x_ref[...].astype(jnp.float32)                       # (tm, d_in)
        for i in range(num_layers):
            w = refs[1 + 2 * i][...]
            b = refs[2 + 2 * i][...].astype(jnp.float32)         # (1, d_out_i)
            if mxu_dtype is not None:
                lhs = h.astype(mxu_dtype)
                rhs = w.astype(mxu_dtype)
            else:
                lhs = h
                rhs = w.astype(jnp.float32)
            # MXU matmul with f32 accumulation; bias broadcast on the VPU.
            h = jnp.dot(lhs, rhs, preferred_element_type=jnp.float32) + b
            if i < num_layers - 1:
                h = jnp.maximum(h, 0.0)                          # ReLU

        out_ref[...] = h.astype(out_ref.dtype)                   # single store

    return kernel


# ----------------------------------------------------------------------------
# Wrapper: tiling, BlockSpecs, pallas_call.
# ----------------------------------------------------------------------------
def mlp_forward(x, weights, biases, *, block_rows: int = 256, mxu_dtype=None):
    """Pallas TPU forward pass of the DETR MLP.

    x:        (..., input_dim)
    weights:  list of (d_in_i, d_out_i) matrices
    biases:   list of (d_out_i,) vectors
    Returns:  (..., output_dim) with the same dtype as x.
    """
    assert len(weights) == len(biases) and len(weights) >= 1
    assert block_rows % 8 == 0, "row tile must be a multiple of 8 sublanes"

    d_in = x.shape[-1]
    lead_shape = x.shape[:-1]
    d_out = weights[-1].shape[-1]

    x2 = x.reshape(-1, d_in)
    m = x2.shape[0]

    if m <= block_rows:
        tm = m                      # single tile == full dim (always tiling-legal)
        xp, mp = x2, m
    else:
        tm = block_rows
        pad = (-m) % tm
        xp = jnp.pad(x2, ((0, pad), (0, 0))) if pad else x2
        mp = m + pad
    grid = (mp // tm,)

    in_specs = [pl.BlockSpec((tm, d_in), lambda i: (i, 0))]
    args = [xp]
    for w, b in zip(weights, biases):
        b2 = b.reshape(1, -1)
        # Constant block index -> the pipeline DMAs these once and keeps them
        # resident in VMEM across all row tiles.
        in_specs.append(pl.BlockSpec(w.shape, lambda i: (0, 0)))
        in_specs.append(pl.BlockSpec(b2.shape, lambda i: (0, 0)))
        args.append(w)
        args.append(b2)

    out = pl.pallas_call(
        _make_mlp_kernel(len(weights), mxu_dtype),
        grid=grid,
        in_specs=in_specs,
        out_specs=pl.BlockSpec((tm, d_out), lambda i: (i, 0)),
        out_shape=jax.ShapeDtypeStruct((mp, d_out), x.dtype),
        compiler_params=pltpu.CompilerParams(
            dimension_semantics=("parallel",)),
    )(*args)

    if mp != m:
        out = out[:m]
    return out.reshape(*lead_shape, d_out)


# ----------------------------------------------------------------------------
# Pure-JAX reference (mirrors the PyTorch MLP.forward exactly).
# ----------------------------------------------------------------------------
def _mlp_reference(x, weights, biases):
    h = x
    n = len(weights)
    for i, (w, b) in enumerate(zip(weights, biases)):
        h = h @ w + b
        if i < n - 1:
            h = jax.nn.relu(h)
    return h


if __name__ == "__main__":
    key = jax.random.PRNGKey(0)

    # DETR-style bbox head: MLP(hidden_dim, hidden_dim, 4, num_layers=3)
    batch, seq = 2, 8
    input_dim, hidden_dim, output_dim, num_layers = 32, 32, 4, 3

    keys = jax.random.split(key, 2 * num_layers + 1)
    x = jax.random.normal(keys[0], (batch, seq, input_dim), jnp.float32)

    dims = [input_dim] + [hidden_dim] * (num_layers - 1) + [output_dim]
    weights, biases = [], []
    for i in range(num_layers):
        bound = 1.0 / (dims[i] ** 0.5)   # nn.Linear default init range
        weights.append(jax.random.uniform(
            keys[1 + 2 * i], (dims[i], dims[i + 1]), jnp.float32, -bound, bound))
        biases.append(jax.random.uniform(
            keys[2 + 2 * i], (dims[i + 1],), jnp.float32, -bound, bound))

    ref = _mlp_reference(x, weights, biases)

    # f32 path (matches nn.Linear semantics).
    out_f32 = mlp_forward(x, weights, biases)
    jax.block_until_ready(out_f32)
    assert out_f32.shape == (batch, seq, output_dim)
    assert bool(jnp.allclose(out_f32, ref, atol=1e-2, rtol=1e-2)), (
        "f32 kernel mismatch, max abs err = "
        f"{float(jnp.max(jnp.abs(out_f32 - ref)))}")

    # bf16 MXU path (perf-review item): bf16 operands, f32 accumulation.
    out_bf16 = mlp_forward(x, weights, biases, mxu_dtype=jnp.bfloat16)
    jax.block_until_ready(out_bf16)
    assert bool(jnp.allclose(out_bf16, ref, atol=5e-2, rtol=5e-2)), (
        "bf16 kernel mismatch, max abs err = "
        f"{float(jnp.max(jnp.abs(out_bf16 - ref)))}")

    print("KERNEL_OK")
</pallas_src>

<mosaic_0001>
module attributes {stable_mosaic.version = 11 : i64} {
  func.func @kernel(%arg0: i32, %arg1: memref<16x32xf32, #tpu.memory_space<vmem>>, %arg2: memref<32x32xf32, #tpu.memory_space<vmem>>, %arg3: memref<1x32xf32, #tpu.memory_space<vmem>>, %arg4: memref<32x32xf32, #tpu.memory_space<vmem>>, %arg5: memref<1x32xf32, #tpu.memory_space<vmem>>, %arg6: memref<32x4xf32, #tpu.memory_space<vmem>>, %arg7: memref<1x4xf32, #tpu.memory_space<vmem>>, %arg8: memref<16x4xf32, #tpu.memory_space<vmem>>) attributes {dimension_semantics = [#tpu.dimension_semantics<parallel>], iteration_bounds = array<i64: 1>, scalar_prefetch = 0 : i64, scratch_operands = 0 : i64, tpu.core_type = #tpu.core_type<tc>, window_params = [{transform_indices = @transform_0, window_bounds = array<i64: 16, 32>}, {pipeline_mode = #tpu.pipeline_mode<synchronous>, transform_indices = @transform_1, window_bounds = array<i64: 32, 32>}, {pipeline_mode = #tpu.pipeline_mode<synchronous>, transform_indices = @transform_2, window_bounds = array<i64: 1, 32>}, {pipeline_mode = #tpu.pipeline_mode<synchronous>, transform_indices = @transform_3, window_bounds = array<i64: 32, 32>}, {pipeline_mode = #tpu.pipeline_mode<synchronous>, transform_indices = @transform_4, window_bounds = array<i64: 1, 32>}, {pipeline_mode = #tpu.pipeline_mode<synchronous>, transform_indices = @transform_5, window_bounds = array<i64: 32, 4>}, {pipeline_mode = #tpu.pipeline_mode<synchronous>, transform_indices = @transform_6, window_bounds = array<i64: 1, 4>}, {transform_indices = @transform_7, window_bounds = array<i64: 16, 4>}]} {
    %c0 = arith.constant 0 : index
    %c0_0 = arith.constant 0 : index
    %0 = vector.load %arg1[%c0, %c0_0] : memref<16x32xf32, #tpu.memory_space<vmem>>, vector<16x32xf32>
    %c0_1 = arith.constant 0 : index
    %c0_2 = arith.constant 0 : index
    %1 = vector.load %arg2[%c0_1, %c0_2] : memref<32x32xf32, #tpu.memory_space<vmem>>, vector<32x32xf32>
    %c0_3 = arith.constant 0 : index
    %c0_4 = arith.constant 0 : index
    %2 = vector.load %arg3[%c0_3, %c0_4] : memref<1x32xf32, #tpu.memory_space<vmem>>, vector<1x32xf32>
    %cst = arith.constant dense<0.000000e+00> : vector<16x32xf32>
    %3 = tpu.matmul %0, %1, %cst {dimension_numbers = #tpu.dot_dimension_numbers<[1], [0], [0], [1], [0, 0, 1, 1], [], []>} : vector<16x32xf32>, vector<32x32xf32>, vector<16x32xf32> -> vector<16x32xf32>
    %4 = vector.broadcast %2 : vector<1x32xf32> to vector<16x32xf32>
    %5 = arith.addf %3, %4 : vector<16x32xf32>
    %cst_5 = arith.constant 0.000000e+00 : f32
    %6 = vector.broadcast %cst_5 : f32 to vector<16x32xf32>
    %7 = arith.maximumf %5, %6 : vector<16x32xf32>
    %c0_6 = arith.constant 0 : index
    %c0_7 = arith.constant 0 : index
    %8 = vector.load %arg4[%c0_6, %c0_7] : memref<32x32xf32, #tpu.memory_space<vmem>>, vector<32x32xf32>
    %c0_8 = arith.constant 0 : index
    %c0_9 = arith.constant 0 : index
    %9 = vector.load %arg5[%c0_8, %c0_9] : memref<1x32xf32, #tpu.memory_space<vmem>>, vector<1x32xf32>
    %cst_10 = arith.constant dense<0.000000e+00> : vector<16x32xf32>
    %10 = tpu.matmul %7, %8, %cst_10 {dimension_numbers = #tpu.dot_dimension_numbers<[1], [0], [0], [1], [0, 0, 1, 1], [], []>} : vector<16x32xf32>, vector<32x32xf32>, vector<16x32xf32> -> vector<16x32xf32>
    %11 = vector.broadcast %9 : vector<1x32xf32> to vector<16x32xf32>
    %12 = arith.addf %10, %11 : vector<16x32xf32>
    %cst_11 = arith.constant 0.000000e+00 : f32
    %13 = vector.broadcast %cst_11 : f32 to vector<16x32xf32>
    %14 = arith.maximumf %12, %13 : vector<16x32xf32>
    %c0_12 = arith.constant 0 : index
    %c0_13 = arith.constant 0 : index
    %15 = vector.load %arg6[%c0_12, %c0_13] : memref<32x4xf32, #tpu.memory_space<vmem>>, vector<32x4xf32>
    %c0_14 = arith.constant 0 : index
    %c0_15 = arith.constant 0 : index
    %16 = vector.load %arg7[%c0_14, %c0_15] : memref<1x4xf32, #tpu.memory_space<vmem>>, vector<1x4xf32>
    %cst_16 = arith.constant dense<0.000000e+00> : vector<16x4xf32>
    %17 = tpu.matmul %14, %15, %cst_16 {dimension_numbers = #tpu.dot_dimension_numbers<[1], [0], [0], [1], [0, 0, 1, 1], [], []>} : vector<16x32xf32>, vector<32x4xf32>, vector<16x4xf32> -> vector<16x4xf32>
    %18 = vector.broadcast %16 : vector<1x4xf32> to vector<16x4xf32>
    %19 = arith.addf %17, %18 : vector<16x4xf32>
    %c0_17 = arith.constant 0 : index
    %c0_18 = arith.constant 0 : index
    %20 = vector.load %arg8[%c0_17, %c0_18] : memref<16x4xf32, #tpu.memory_space<vmem>>, vector<16x4xf32>
    tpu.vector_store %arg8[%c0_17, %c0_18], %19 {strides = array<i32>} : memref<16x4xf32, #tpu.memory_space<vmem>>, vector<16x4xf32>,
    return
  }
  func.func @transform_0(%arg0: i32) -> (i32, i32) {
    %c0_i32 = arith.constant 0 : i32
    %c0_i32_0 = arith.constant 0 : i32
    return %arg0, %c0_i32 : i32, i32
  }
  func.func @transform_1(%arg0: i32) -> (i32, i32) {
    %c0_i32 = arith.constant 0 : i32
    %c0_i32_0 = arith.constant 0 : i32
    %c0_i32_1 = arith.constant 0 : i32
    return %c0_i32, %c0_i32_0 : i32, i32
  }
  func.func @transform_2(%arg0: i32) -> (i32, i32) {
    %c0_i32 = arith.constant 0 : i32
    %c0_i32_0 = arith.constant 0 : i32
    %c0_i32_1 = arith.constant 0 : i32
    return %c0_i32, %c0_i32_0 : i32, i32
  }
  func.func @transform_3(%arg0: i32) -> (i32, i32) {
    %c0_i32 = arith.constant 0 : i32
    %c0_i32_0 = arith.constant 0 : i32
    %c0_i32_1 = arith.constant 0 : i32
    return %c0_i32, %c0_i32_0 : i32, i32
  }
  func.func @transform_4(%arg0: i32) -> (i32, i32) {
    %c0_i32 = arith.constant 0 : i32
    %c0_i32_0 = arith.constant 0 : i32
    %c0_i32_1 = arith.constant 0 : i32
    return %c0_i32, %c0_i32_0 : i32, i32
  }
  func.func @transform_5(%arg0: i32) -> (i32, i32) {
    %c0_i32 = arith.constant 0 : i32
    %c0_i32_0 = arith.constant 0 : i32
    %c0_i32_1 = arith.constant 0 : i32
    return %c0_i32, %c0_i32_0 : i32, i32
  }
  func.func @transform_6(%arg0: i32) -> (i32, i32) {
    %c0_i32 = arith.constant 0 : i32
    %c0_i32_0 = arith.constant 0 : i32
    %c0_i32_1 = arith.constant 0 : i32
    return %c0_i32, %c0_i32_0 : i32, i32
  }
  func.func @transform_7(%arg0: i32) -> (i32, i32) {
    %c0_i32 = arith.constant 0 : i32
    %c0_i32_0 = arith.constant 0 : i32
    return %arg0, %c0_i32 : i32, i32
  }
}

</mosaic_0001>

<bundles_post_ra>
// kernel: tpu_custom_call.1
= control target key start
LH: loop header
LB: loop body
LE: loop exit
PB: predicated region body
PF: predicated region fallthrough
CT: control target
= control target key end

     0   :  { %12 = vsyncpa [#allocation3], 0  ;;  %s595_s0 = inlined_call_operand.hbm [shape: f32[16,32], index: 0, kind: input, shape index: {}]   ;;  %s596_s1 = inlined_call_operand.vmem [shape: f32[32,32], index: 1, kind: input, shape index: {}]   ;;  %s597_s2 = inlined_call_operand.vmem [shape: f32[1,32], index: 2, kind: input, shape index: {}]   ;;  %s598_s3 = inlined_call_operand.hbm [shape: f32[32,32], index: 3, kind: input, shape index: {}]   ;;  %s599_s4 = inlined_call_operand.vmem [shape: f32[1,32], index: 4, kind: input, shape index: {}]   ;;  %s600_s5 = inlined_call_operand.vmem [shape: f32[32,4], index: 5, kind: input, shape index: {}]   ;;  %s601_s6 = inlined_call_operand.vmem [shape: f32[1,4], index: 6, kind: input, shape index: {}]   ;;  %s602_s7 = inlined_call_operand.vmem [shape: f32[16,4], index: 7, kind: output, shape index: {}]  }
   0x1   :  { %13 = vsyncpa [#allocation5], 0  ;;  %s482_s24 = smov [#allocation2]   ;;  %s434_s28 = scalar_lea.hbm %s595_s0, 256 }
   0x2   :  { %s19_s25 = sshll.u32 %s482_s24, 4  ;;  %p435_p0 = scmp.ne.s32.totalorder %s595_s0, %s434_s28  ;;  %s20_s25 = int_to_ptr.vmem [resolvable:$true] %s19_s25 }
   0x3   :  { %p438_p1 = scmp.lt.u32.totalorder %s434_s28, %s595_s0 }
   0x5   :  { %p440_p2 = pnand %p438_p1, %p435_p0 }
   0x7   :  { %443 = shalt.err (!%p440_p2)
}
   0x8   :  { %s444_s10 = scalar_lea.vmem %s20_s25, 256  ;;  %p449_p4 = scmp.lt.s32.totalorder %s20_s25, %s20_s25 }
   0x9   :  { %p445_p3 = scmp.ne.s32.totalorder %s20_s25, %s444_s10  ;;  %p450_p5 = scmp.lt.s32.totalorder %s444_s10, %s444_s10 }
   0xb   :  { %p451_p6 = por %p450_p5, %p449_p4 }
   0xd   :  { %p452_p7 = pnand %p451_p6, %p445_p3 }
   0xf   :  { %455 = shalt.err (!%p452_p7)
}
  0x10   :  { %s483_s11 = smov 128   ;;  %s484_s12 = smov 8  }
  0x11   :  { %25 = dma.hbm_to_vmem [thread:$0]  %s595_s0, 256, %s20_s25, [#allocation3], %s483_s11, %s483_s11, %s484_s12  }
  0x12   :  { %s485_s15 = smov [#allocation4]   ;;  %s456_s19 = scalar_lea.hbm %s598_s3, 512 }
  0x13   :  { %s35_s16 = sshll.u32 %s485_s15, 4  ;;  %p457_p8 = scmp.ne.s32.totalorder %s598_s3, %s456_s19  ;;  %s36_s16 = int_to_ptr.vmem [resolvable:$true] %s35_s16 }
  0x14   :  { %p460_p9 = scmp.lt.u32.totalorder %s456_s19, %s598_s3 }
  0x16   :  { %p462_p10 = pnand %p460_p9, %p457_p8 }
  0x18   :  { %465 = shalt.err (!%p462_p10)
}
  0x19   :  { %s466_s24 = scalar_lea.vmem %s36_s16, 512  ;;  %p471_p12 = scmp.lt.s32.totalorder %s36_s16, %s36_s16 }
  0x1a   :  { %p467_p11 = scmp.ne.s32.totalorder %s36_s16, %s466_s24  ;;  %p472_p13 = scmp.lt.s32.totalorder %s466_s24, %s466_s24 }
  0x1c   :  { %p473_p0 = por %p472_p13, %p471_p12 }
  0x1e   :  { %p474_p1 = pnand %p473_p0, %p467_p11 }
  0x20   :  { %477 = shalt.err (!%p474_p1)
}
  0x21   :  { %41 = dma.hbm_to_vmem [thread:$0]  %s598_s3, 512, %s36_s16, [#allocation5], %s483_s11, %s483_s11, %s484_s12  }
  0x22   :  { %478 = dma.done.wait [#allocation3], 256  }
  0x23   :  { %479 = vsyncadd [#allocation3], 4294967040 }
  0x24   :  { %480 = dma.done.wait [#allocation5], 512  }
  0x25   :  { %481 = vsyncadd [#allocation5], 4294966784  ;;  %vm67_vm0 = vcmask 261120   ;;  %v56_v0 = vld [vmem:[%s596_s1] sm:$0xff]  ;;  %v57_v1 = vld [vmem:[%s596_s1 + $0x8] sm:$0xff]  ;;  %vm337_vm1 = vcmask 31744  }
  0x26   :  { %v58_v2 = vld [vmem:[%s596_s1 + $0x10] sm:$0xff]  ;;  %v406_v3 = vpack.c.bf16 %v57_v1, %v56_v0  ;;  %v59_v4 = vld [vmem:[%s596_s1 + $0x18] sm:$0xff]  ;;  %v54_v5 = vld [vmem:[#allocation2] sm:$0xff] }
  0x27   :  { %v410_v6 = vpack.c.bf16 %v59_v4, %v58_v2  ;;  %381 = vmatprep.mubr.msk.f32.mxu0 %vm67_vm0, %v54_v5  ;;  %v151_v7 = vld [vmem:[#allocation4] sm:$0xff]  ;;  %v152_v8 = vld [vmem:[#allocation4 + $0x8] sm:$0xff]  ;;  %v55_v10 = vld [vmem:[#allocation2 + $0x8] sm:$0xff] }
  0x28   :  { %407 = vmatprep.subr.bf16.mxu0 %v406_v3  ;;  %v414_v9 = vpack.c.bf16 %v152_v8, %v151_v7  ;;  %v153_v11 = vld [vmem:[#allocation4 + $0x10] sm:$0xff]  ;;  %v154_v12 = vld [vmem:[#allocation4 + $0x18] sm:$0xff]  ;;  %v247_v24 = vld [vmem:[%s600_s5 + $0x10] sm:$0xff] }
  0x29   :  { %409 = vmatpush3.bf16.msra.mxu0 %v406_v3  ;;  %v418_v13 = vpack.c.bf16 %v154_v12, %v153_v11  ;;  %v245_v14 = vld [vmem:[%s600_s5] sm:$0xff]  ;;  %v246_v15 = vld [vmem:[%s600_s5 + $0x8] sm:$0xff]  ;;  %v248_v25 = vld [vmem:[%s600_s5 + $0x18] sm:$0xff] }
  0x2a   :  { %411 = vmatprep.subr.bf16.mxu0 %v410_v6  ;;  %415 = vmatprep.subr.bf16.mxu1 %v414_v9  ;;  %v422_v16 = vpack.c.bf16 %v246_v15, %v245_v14  ;;  %v346_v17 = vld [vmem:[%s597_s2] ss:$0 sm:$0xff]  ;;  %v426_v26 = vpack.c.bf16 %v248_v25, %v247_v24 }
  0x2b   :  { %417 = vmatpush3.bf16.msra.mxu1 %v414_v9  ;;  %v349_v27 = vld [vmem:[%s599_s4] ss:$0 sm:$0xff] }
  0x2c   :  { %419 = vmatprep.subr.bf16.mxu1 %v418_v13  ;;  %v352_v34 = vld [vmem:[%s601_s6] ss:$0 sm:$0xff] }
  0x2d   :  { %413 = vmatpush3.bf16.msra.mxu0 %v410_v6 }
  0x2e   :  { %423 = vmatprep.subr.bf16.mxu0 %v422_v16 }
  0x2f   :  { %421 = vmatpush3.bf16.msra.mxu1 %v418_v13 }
  0x30   :  { %382 = vmatmul.mubr.msk.f32.vlgmr.msra.gmra.mrb[0].mxu0 %vm67_vm0, %v55_v10 }
  0x31   :  { %425 = vmatpush3.bf16.msra.mxu0 %v422_v16 }
  0x32   :  { %427 = vmatprep.subr.bf16.mxu0 %v426_v26 }
  0x35   :  { %429 = vmatpush3.bf16.msra.mxu0 %v426_v26 }
 0x103   :  { %v383_v18 = vpop.f32.mrb[0].mxu0 }
 0x104   :  { %v146_v19 = vadd.f32 %v383_v18, %v346_v17  ;;  %v140_v20 = vpop.f32.mrb[1].mxu0 }
 0x105   :  { %v141_v21 = vadd.f32 %v346_v17, %v140_v20 }
 0x106   :  { %v150_v23 = vmax.f32 %v146_v19, 0.0 }
 0x107   :  { %v149_v22 = vmax.f32 %v141_v21, 0.0 }
 0x109   :  { %392 = vmatprep.mubr.msk.f32.mxu1 %vm67_vm0, %v149_v22 }
 0x10a   :  { %393 = vmatmul.mubr.msk.f32.vlgmr.msra.gmra.mrb[0].mxu1 %vm67_vm0, %v150_v23 }
 0x1dd   :  { %v394_v28 = vpop.f32.mrb[0].mxu1 }
 0x1de   :  { %v240_v29 = vadd.f32 %v394_v28, %v349_v27  ;;  %v234_v30 = vpop.f32.mrb[1].mxu1 }
 0x1df   :  { %v235_v31 = vadd.f32 %v349_v27, %v234_v30 }
 0x1e0   :  { %v244_v33 = vmax.f32 %v240_v29, 0.0 }
 0x1e1   :  { %v243_v32 = vmax.f32 %v235_v31, 0.0 }
 0x1e3   :  { %403 = vmatprep.mubr.msk.f32.mxu0 %vm67_vm0, %v243_v32 }
 0x1e4   :  { %404 = vmatmul.mubr.msk.f32.vlgmr.msra.gmra.mrb[2].mxu0 %vm67_vm0, %v244_v33 }
 0x2b7   :  { %v405_v35 = vpop.f32.mrb[2].mxu0 }
 0x2b8   :  { %v334_v36 = vadd.f32 %v405_v35, %v352_v34  ;;  %v328_v37 = vpop.f32.mrb[3].mxu0 }
 0x2b9   :  { %v329_v38 = vadd.f32 %v352_v34, %v328_v37 }
 0x2ba   :  { %339 = vst.msk [vmem:[%s602_s7 + $0x8] sm:$0xff] %vm337_vm1, %v334_v36 }
 0x2bb   :  { %338 = vst.msk [vmem:[%s602_s7] sm:$0xff] %vm337_vm1, %v329_v38 }
 0x2bc   :  { %344 = vsyncpa [#allocation3], 1 }
 0x2bd   :  { %345 = vsyncpa [#allocation5], 1 }

</bundles_post_ra>
